<compile_context>
chip_gen: v6e
topology: v6e:2x2x1
jax: 0.10.0
libtpu: 0.0.40
codegen_flags: <defaults>
</compile_context>

<pallas_src>
import functools

import jax
import jax.numpy as jnp
import numpy as np
from jax.experimental import pallas as pl
from jax.experimental.pallas import tpu as pltpu

_LANE = 128


def _vmem_budget_bytes():
    """Usable scoped-VMEM budget, leaving headroom below physical capacity."""
    try:
        cap = pltpu.get_tpu_info().vmem_capacity_bytes
    except Exception:
        cap = 64 * 1024 * 1024  # conservative default (v7x per-TC VMEM)
    # ~96 MiB on v5e/v6e (128 MiB physical), ~48 MiB on v7x (64 MiB physical).
    return int(cap * 3 // 4)


# --------------------------------------------------------------------------
# Single-pass fused kernel: whole (Bt, C, L) slab resident per grid step.
# --------------------------------------------------------------------------
def _fused_se_kernel(x_ref, w1t_ref, w2_ref, o_ref, *, inv_len):
    # x_ref  : (Bt, C, L)  channels on sublanes, sequence on lanes
    # w1t_ref: (C, H) == W1^T     (Linear(C, H).weight is (H, C))
    # w2_ref : (C, H) == W2       (Linear(H, C).weight is (C, H))
    x = x_ref[...]
    xf = x.astype(jnp.float32)

    # Squeeze: mean over the sequence (lane) axis.  Shapes are exact logical
    # shapes (block == full array dims), so no manual padding mask is needed.
    pooled = jnp.sum(xf, axis=-1, keepdims=True) * inv_len            # (Bt, C, 1)

    # Excite (tiny FC): VPU broadcasts + cross-sublane/lane reduces instead of
    # width-H MXU matmuls (H = C // reduction is tiny, off the DMA critical path).
    w1t = w1t_ref[...].astype(jnp.float32)[None]                      # (1, C, H)
    w2 = w2_ref[...].astype(jnp.float32)[None]                        # (1, C, H)
    h = jnp.sum(w1t * pooled, axis=1, keepdims=True)                  # (Bt, 1, H)
    h = jnp.maximum(h, 0.0)
    s = jax.nn.sigmoid(jnp.sum(w2 * h, axis=2, keepdims=True))        # (Bt, C, 1)

    # Scale: lane-dense store over the full slab.
    o_ref[...] = (xf * s).astype(o_ref.dtype)


def _se_fused(x, w1, w2, *, budget, block_bytes_target):
    B, C, L = x.shape
    H = w1.shape[0]
    slab = C * L * 4  # per-batch-element block, sized at f32 (conservative for bf16)

    # Batch-tile size: big enough to amortize per-grid-step overhead, small
    # enough that double-buffered in+out blocks (+ f32 temps) fit the VMEM
    # budget; keep >= ~4 grid steps when batch allows (multi-core balance).
    bt = max(1, min(B, block_bytes_target // slab, budget // (5 * slab)))
    if B >= 4:
        bt = min(bt, max(1, B // 4))
    nb = pl.cdiv(B, bt)

    vmem_limit = int(min(budget, 5 * bt * slab + 2 * bt * C * H * 4 + (16 << 20)))

    cost = pl.CostEstimate(
        flops=2 * B * C * L + 4 * B * C * H,
        transcendentals=B * C,
        bytes_accessed=2 * B * C * L * x.dtype.itemsize + 2 * C * H * 4,
    )

    return pl.pallas_call(
        functools.partial(_fused_se_kernel, inv_len=1.0 / float(L)),
        out_shape=jax.ShapeDtypeStruct((B, C, L), x.dtype),
        grid_spec=pltpu.PrefetchScalarGridSpec(
            num_scalar_prefetch=0,
            grid=(nb,),
            in_specs=[
                pl.BlockSpec((bt, C, L), lambda b: (b, 0, 0)),   # x
                pl.BlockSpec((C, H), lambda b: (0, 0)),          # W1^T (resident)
                pl.BlockSpec((C, H), lambda b: (0, 0)),          # W2   (resident)
            ],
            out_specs=pl.BlockSpec((bt, C, L), lambda b: (b, 0, 0)),
        ),
        compiler_params=pltpu.CompilerParams(
            dimension_semantics=("parallel",),
            vmem_limit_bytes=vmem_limit,
        ),
        cost_estimate=cost,
    )(x, w1.T, w2)


# --------------------------------------------------------------------------
# Two-pass path for slabs that do not fit the VMEM budget: stream L tiles.
# --------------------------------------------------------------------------
def _pool_sum_kernel(x_ref, acc_ref, *, true_len):
    l = pl.program_id(1)

    @pl.when(l == 0)
    def _():
        acc_ref[...] = jnp.zeros_like(acc_ref)

    x = x_ref[...].astype(jnp.float32)                                # (1, C, Lt)
    lt = x.shape[-1]
    # The last L tile may be a partial (edge) block whose padding lanes hold
    # undefined data -> mask explicitly before reducing.
    lane = jax.lax.broadcasted_iota(jnp.int32, x.shape, dimension=2)
    valid = (l * lt + lane) < true_len
    acc_ref[...] += jnp.sum(jnp.where(valid, x, 0.0), axis=-1, keepdims=True)


def _scale_kernel(x_ref, s_ref, o_ref):
    o_ref[...] = (x_ref[...].astype(jnp.float32) * s_ref[...]).astype(o_ref.dtype)


def _se_two_pass(x, w1, w2, *, budget, block_bytes_target):
    B, C, L = x.shape

    # L tile: lane-aligned, sized to the block-bytes target and VMEM budget.
    # TODO(synk): if C alone is so large that a (1, C, 128) block overflows the
    # budget, additionally tile C (both passes tile trivially over C once s is
    # computed outside the kernel).
    l_full = pl.cdiv(L, _LANE) * _LANE
    lt_cap = (budget // (5 * C * 4)) // _LANE * _LANE
    lt_tgt = (block_bytes_target // (C * 4)) // _LANE * _LANE
    lt = min(l_full, max(_LANE, min(lt_tgt, lt_cap)))
    nl = pl.cdiv(L, lt)

    # Pass 1: per-channel sum over L (accumulated per L tile, i.e. pairwise-ish).
    pooled_sum = pl.pallas_call(
        functools.partial(_pool_sum_kernel, true_len=L),
        out_shape=jax.ShapeDtypeStruct((B, C, 1), jnp.float32),
        grid_spec=pltpu.PrefetchScalarGridSpec(
            num_scalar_prefetch=0,
            grid=(B, nl),
            in_specs=[pl.BlockSpec((1, C, lt), lambda b, l: (b, 0, l))],
            out_specs=pl.BlockSpec((1, C, 1), lambda b, l: (b, 0, 0)),
        ),
        compiler_params=pltpu.CompilerParams(
            dimension_semantics=("parallel", "arbitrary"),
            vmem_limit_bytes=int(min(budget, 4 * C * lt * 4 + (16 << 20))),
        ),
        cost_estimate=pl.CostEstimate(
            flops=2 * B * C * L, transcendentals=0,
            bytes_accessed=B * C * L * x.dtype.itemsize + B * C * 4),
    )(x)

    # Tiny excite FC in plain JAX (negligible flops / bytes between the passes).
    y = pooled_sum[:, :, 0] * (1.0 / float(L))                        # (B, C)
    h = jnp.maximum(y @ w1.T.astype(jnp.float32), 0.0)                # (B, H)
    s = jax.nn.sigmoid(h @ w2.T.astype(jnp.float32)).reshape(B, C, 1)

    # Pass 2: re-stream x and scale.
    return pl.pallas_call(
        _scale_kernel,
        out_shape=jax.ShapeDtypeStruct((B, C, L), x.dtype),
        grid_spec=pltpu.PrefetchScalarGridSpec(
            num_scalar_prefetch=0,
            grid=(B, nl),
            in_specs=[
                pl.BlockSpec((1, C, lt), lambda b, l: (b, 0, l)),
                pl.BlockSpec((1, C, 1), lambda b, l: (b, 0, 0)),
            ],
            out_specs=pl.BlockSpec((1, C, lt), lambda b, l: (b, 0, l)),
        ),
        compiler_params=pltpu.CompilerParams(
            dimension_semantics=("parallel", "parallel"),
            vmem_limit_bytes=int(min(budget, 6 * C * lt * 4 + (16 << 20))),
        ),
        cost_estimate=pl.CostEstimate(
            flops=B * C * L, transcendentals=0,
            bytes_accessed=2 * B * C * L * x.dtype.itemsize + B * C * 4),
    )(x, s)


# --------------------------------------------------------------------------
# Public wrapper
# --------------------------------------------------------------------------
def se_layer_pallas(x, w1, w2, *, block_bytes_target=4 << 20, force_two_pass=False):
    """x: (B, C, L); w1: (H, C) (first Linear weight); w2: (C, H) (second).

    Returns x * sigmoid(relu(mean_L(x) @ w1.T) @ w2.T)[:, :, None], dtype of x.
    """
    B, C, L = x.shape
    H = w1.shape[0]
    assert w1.shape == (H, C) and w2.shape == (C, H) and H >= 1

    budget = _vmem_budget_bytes()
    slab = C * L * 4  # one batch element's slab at f32

    if force_two_pass or 5 * slab > budget:
        return _se_two_pass(x, w1, w2, budget=budget,
                            block_bytes_target=block_bytes_target)
    return _se_fused(x, w1, w2, budget=budget,
                     block_bytes_target=block_bytes_target)


def se_layer_ref(x, w1, w2):
    """Pure-JAX reference matching the PyTorch SELayer.forward semantics."""
    y = jnp.mean(x, axis=-1)                 # (B, C)   AdaptiveAvgPool1d(1)
    y = jnp.maximum(y @ w1.T, 0.0)           # (B, H)   Linear + ReLU
    y = jax.nn.sigmoid(y @ w2.T)             # (B, C)   Linear + Sigmoid
    return x * y[:, :, None]                 # channel-wise rescale


if __name__ == "__main__":
    root = jax.random.PRNGKey(0)
    k_a, k_b, k_c = jax.random.split(root, 3)

    def make_inputs(key, B, C, L, reduction, dtype=jnp.float32):
        H = max(1, C // reduction)
        kx, k1, k2 = jax.random.split(key, 3)
        x = jax.random.normal(kx, (B, C, L), jnp.float32).astype(dtype)
        # PyTorch Linear default init: U(-1/sqrt(fan_in), 1/sqrt(fan_in)), bias=False.
        w1 = jax.random.uniform(k1, (H, C), jnp.float32,
                                -1.0 / np.sqrt(C), 1.0 / np.sqrt(C))
        w2 = jax.random.uniform(k2, (C, H), jnp.float32,
                                -1.0 / np.sqrt(H), 1.0 / np.sqrt(H))
        return x, w1, w2

    # 1) Fused single-pass path, ragged L (no wrapper pad / output slice).
    x, w1, w2 = make_inputs(k_a, B=4, C=64, L=200, reduction=16)
    out = jax.block_until_ready(se_layer_pallas(x, w1, w2))
    np.testing.assert_allclose(np.asarray(out), np.asarray(se_layer_ref(x, w1, w2)),
                               rtol=1e-5, atol=1e-5)
    assert out.shape == x.shape and out.dtype == x.dtype

    # 2) Two-pass (large-slab) path, forced at small shape so L-tiling and the
    #    masked edge tile are exercised (Lt = 128, L = 200 -> 2 tiles).
    x2, w12, w22 = make_inputs(k_b, B=2, C=32, L=200, reduction=16)
    out2 = jax.block_until_ready(
        se_layer_pallas(x2, w12, w22, block_bytes_target=16 * 1024,
                        force_two_pass=True))
    np.testing.assert_allclose(np.asarray(out2),
                               np.asarray(se_layer_ref(x2, w12, w22)),
                               rtol=1e-5, atol=1e-5)

    # 3) bf16 I/O (HBM-bound kernel -> ~2x less traffic on v6e/v7x).
    xb, w1b, w2b = make_inputs(k_c, B=2, C=64, L=256, reduction=16,
                               dtype=jnp.bfloat16)
    outb = jax.block_until_ready(se_layer_pallas(xb, w1b, w2b))
    refb = se_layer_ref(xb.astype(jnp.float32), w1b, w2b)
    np.testing.assert_allclose(np.asarray(outb.astype(jnp.float32)),
                               np.asarray(refb), rtol=2e-2, atol=2e-2)

    print("KERNEL_OK")
</pallas_src>

<mosaic_0001>
module attributes {stable_mosaic.version = 11 : i64} {
  func.func @_fused_se_kernel(%arg0: i32, %arg1: memref<1x64x200xf32, #tpu.memory_space<vmem>>, %arg2: memref<64x4xf32, #tpu.memory_space<vmem>>, %arg3: memref<64x4xf32, #tpu.memory_space<vmem>>, %arg4: memref<1x64x200xf32, #tpu.memory_space<vmem>>) attributes {dimension_semantics = [#tpu.dimension_semantics<parallel>], iteration_bounds = array<i64: 4>, scalar_prefetch = 0 : i64, scratch_operands = 0 : i64, tpu.core_type = #tpu.core_type<tc>, window_params = [{transform_indices = @transform_0, window_bounds = array<i64: 1, 64, 200>}, {pipeline_mode = #tpu.pipeline_mode<synchronous>, transform_indices = @transform_1, window_bounds = array<i64: 64, 4>}, {pipeline_mode = #tpu.pipeline_mode<synchronous>, transform_indices = @transform_2, window_bounds = array<i64: 64, 4>}, {transform_indices = @transform_3, window_bounds = array<i64: 1, 64, 200>}]} {
    %c0 = arith.constant 0 : index
    %c0_0 = arith.constant 0 : index
    %c0_1 = arith.constant 0 : index
    %0 = vector.load %arg1[%c0, %c0_0, %c0_1] : memref<1x64x200xf32, #tpu.memory_space<vmem>>, vector<1x64x200xf32>
    %cst = arith.constant dense<0.000000e+00> : vector<1x64xf32>
    %1 = vector.multi_reduction <add>, %0, %cst [2] : vector<1x64x200xf32> to vector<1x64xf32>
    %2 = vector.shape_cast %1 : vector<1x64xf32> to vector<1x64x1xf32>
    %cst_2 = arith.constant 5.000000e-03 : f32
    %3 = vector.broadcast %cst_2 : f32 to vector<1x64x1xf32>
    %4 = arith.mulf %2, %3 : vector<1x64x1xf32>
    %c0_3 = arith.constant 0 : index
    %c0_4 = arith.constant 0 : index
    %5 = vector.load %arg2[%c0_3, %c0_4] : memref<64x4xf32, #tpu.memory_space<vmem>>, vector<64x4xf32>
    %6 = vector.shape_cast %5 : vector<64x4xf32> to vector<1x64x4xf32>
    %c0_5 = arith.constant 0 : index
    %c0_6 = arith.constant 0 : index
    %7 = vector.load %arg3[%c0_5, %c0_6] : memref<64x4xf32, #tpu.memory_space<vmem>>, vector<64x4xf32>
    %8 = vector.shape_cast %7 : vector<64x4xf32> to vector<1x64x4xf32>
    %9 = vector.broadcast %4 : vector<1x64x1xf32> to vector<1x64x4xf32>
    %10 = arith.mulf %6, %9 : vector<1x64x4xf32>
    %cst_7 = arith.constant dense<0.000000e+00> : vector<1x4xf32>
    %11 = vector.multi_reduction <add>, %10, %cst_7 [1] : vector<1x64x4xf32> to vector<1x4xf32>
    %12 = vector.shape_cast %11 : vector<1x4xf32> to vector<1x1x4xf32>
    %cst_8 = arith.constant 0.000000e+00 : f32
    %13 = vector.broadcast %cst_8 : f32 to vector<1x1x4xf32>
    %14 = arith.maximumf %12, %13 : vector<1x1x4xf32>
    %15 = vector.broadcast %14 : vector<1x1x4xf32> to vector<1x64x4xf32>
    %16 = arith.mulf %8, %15 : vector<1x64x4xf32>
    %cst_9 = arith.constant dense<0.000000e+00> : vector<1x64xf32>
    %17 = vector.multi_reduction <add>, %16, %cst_9 [2] : vector<1x64x4xf32> to vector<1x64xf32>
    %18 = vector.shape_cast %17 : vector<1x64xf32> to vector<1x64x1xf32>
    %19 = arith.negf %18 : vector<1x64x1xf32>
    %20 = math.exp %19 : vector<1x64x1xf32>
    %cst_10 = arith.constant 1.000000e+00 : f32
    %21 = vector.broadcast %cst_10 : f32 to vector<1x64x1xf32>
    %22 = arith.addf %21, %20 : vector<1x64x1xf32>
    %23 = arith.divf %21, %22 : vector<1x64x1xf32>
    %24 = vector.broadcast %23 : vector<1x64x1xf32> to vector<1x64x200xf32>
    %25 = arith.mulf %0, %24 : vector<1x64x200xf32>
    %c0_11 = arith.constant 0 : index
    %c0_12 = arith.constant 0 : index
    %c0_13 = arith.constant 0 : index
    %26 = vector.load %arg4[%c0_11, %c0_12, %c0_13] : memref<1x64x200xf32, #tpu.memory_space<vmem>>, vector<1x64x200xf32>
    tpu.vector_store %arg4[%c0_11, %c0_12, %c0_13], %25 {strides = array<i32>} : memref<1x64x200xf32, #tpu.memory_space<vmem>>, vector<1x64x200xf32>,
    return
  }
  func.func @transform_0(%arg0: i32) -> (i32, i32, i32) {
    %c0_i32 = arith.constant 0 : i32
    %c0_i32_0 = arith.constant 0 : i32
    %c0_i32_1 = arith.constant 0 : i32
    return %arg0, %c0_i32, %c0_i32_0 : i32, i32, i32
  }
  func.func @transform_1(%arg0: i32) -> (i32, i32) {
    %c0_i32 = arith.constant 0 : i32
    %c0_i32_0 = arith.constant 0 : i32
    %c0_i32_1 = arith.constant 0 : i32
    return %c0_i32, %c0_i32_0 : i32, i32
  }
  func.func @transform_2(%arg0: i32) -> (i32, i32) {
    %c0_i32 = arith.constant 0 : i32
    %c0_i32_0 = arith.constant 0 : i32
    %c0_i32_1 = arith.constant 0 : i32
    return %c0_i32, %c0_i32_0 : i32, i32
  }
  func.func @transform_3(%arg0: i32) -> (i32, i32, i32) {
    %c0_i32 = arith.constant 0 : i32
    %c0_i32_0 = arith.constant 0 : i32
    %c0_i32_1 = arith.constant 0 : i32
    return %arg0, %c0_i32, %c0_i32_0 : i32, i32, i32
  }
}

</mosaic_0001>

<bundles_post_ra>
// kernel: tpu_custom_call.1
= control target key start
LH: loop header
LB: loop body
LE: loop exit
PB: predicated region body
PF: predicated region fallthrough
CT: control target
= control target key end

     0   :  { %8 = vsyncpa [#allocation3], 0  ;;  %s1055_s0 = inlined_call_operand.hbm [shape: f32[4,64,200], index: 0, kind: input, shape index: {}]   ;;  %s1056_s1 = inlined_call_operand.vmem [shape: f32[64,4], index: 1, kind: input, shape index: {}]   ;;  %s1057_s2 = inlined_call_operand.vmem [shape: f32[64,4], index: 2, kind: input, shape index: {}]   ;;  %s1058_s3 = inlined_call_operand.hbm [shape: f32[4,64,200], index: 3, kind: output, shape index: {}]  }
   0x1   :  { %10 = vsyncpa [#allocation3 + $0x1], 0 }
   0x2   :  { %11 = vsyncpa [#allocation4], 0 }
   0x3   :  { %13 = vsyncpa [#allocation4 + $0x1], 0  ;;  %s718_s12 = smov 0   ;;  %s720_s13 = smov 0  }
   0x4   :  { %s722_s14 = smov 0   ;;  %s724_s15 = smov 0  }
   0x5 LB: > { %s739_s16 = sadd.s32 4294967295, %s690_s15   ;;  %s492_s17 = sadd.s32 4294967294, %s690_s15   ;;  %s690_s15 = sphi %s724_s15, %s1072_s15   ;;  %s686_s14 = sphi %s722_s14, %s1071_s14   ;;  %s682_s13 = sphi %s720_s13, %s1070_s13   ;;  %s678_s12 = sphi %s718_s12, %s1069_s12  }
   0x6   : > { %s743_s18 = sadd.s32 1, %s690_s15   ;;  %s26_s19 = sadd.s32 1, %s686_s14 }
   0x7   : > { %s23_s20 = ssub.s32 %s690_s15, %s743_s18  ;;  %p33_p0 = scmp.ne.s32.totalorder %s686_s14, %s682_s13 }
   0x8   : > { %p24_p1 = scmp.eq.s32.totalorder %s23_s20, 0  ;;  %p34_p2 = scmp.eq.s32.totalorder %s690_s15, 0 }
   0x9   : > { %p39_p3 = scmp.ne.s32.totalorder %s682_s13, %s678_s12  ;;  %p40_p4 = scmp.eq.s32.totalorder %s739_s16, 0 }
   0xa   : > { %s755_s21 = scalar_select %p24_p1, %s686_s14, %s26_s19  }
   0xb   : > { %p757_p5 = por %p34_p2, %p33_p0  ;;  %p761_p6 = por %p40_p4, %p39_p3 }
   0xc   : > { %p105_p7 = scmp.eq.s32.totalorder %s739_s16, 3  ;;  %p111_p8 = scmp.eq.s32.totalorder %s492_s17, 3 }
   0xd   : > { %s1062_s23 = scalar_select %p761_p6, 1, 0 }
   0xe   : > { %p528_p9 = scmp.lt.s32.totalorder %s690_s15, 4  ;;  %p767_p10 = por %p105_p7, %p33_p0 }
   0xf   : > { %p771_p11 = por %p111_p8, %p39_p3  ;;  %s137_s26 = sand.u32 1, %s686_s14  }
  0x10   : > { %s1063_s24 = scalar_select %p767_p10, 1, 0 }
  0x11   : > { %s1064_s25 = scalar_select %p771_p11, 1, 0 }
  0x12   : > { %s514_s27 = sshll.u32 %s690_s15, 11  ;;  %s495_s28 = sshll.u32 %s137_s26, 7 }
  0x13   : > { %s780_s4 = scalar_lea.hbm %s1055_s0, %s514_s27  ;;  %s141_s5 = scalar_lea.vmem [#allocation2], %s495_s28 }
  0x14   : > { %s148_s6 = sshll.u32 %s141_s5, 4  ;;  %p784_p12 = pnand %p528_p9, %p757_p5  ;;  %s788_s6 = int_to_ptr.vmem [resolvable:$true] %s148_s6 }
  0x15   : > { %s790_s8 = scalar_lea.sflag [#allocation3], %s137_s26  ;;  %s598_s9 = scalar_lea.hbm %s780_s4, 2048 }
  0x16   : > { %p599_p13 = scmp.ne.s32.totalorder %s780_s4, %s598_s9  ;;  %p600_p0 = pneg %p784_p12 }
  0x17   : > { %s603_s17 = scalar_lea.hbm %s1055_s0, 8192  ;;  %p604_p3 = scmp.lt.s32.totalorder %s780_s4, %s1055_s0 }
  0x18   : > { %p601_p1 = pnand %p600_p0, %p599_p13  ;;  %p605_p4 = scmp.lt.s32.totalorder %s603_s17, %s598_s9 }
  0x1a   : > { %p602_p2 = pneg %p601_p1  ;;  %p606_p5 = por %p605_p4, %p604_p3 }
  0x1c   : > { %p607_p7 = pnand %p606_p5, %p602_p2 }
  0x1e   : > { %610 = shalt.err (!%p607_p7)
}
  0x1f   : > { %s611_s22 = scalar_lea.vmem %s788_s6, 2048  ;;  %s692_s26 = smov [#allocation2]  }
  0x20   : > { %p612_p8 = scmp.ne.s32.totalorder %s788_s6, %s611_s22  ;;  %s616_s27 = sshll.u32 %s692_s26, 4  ;;  %s617_s27 = int_to_ptr.vmem [resolvable:$false] %s616_s27 }
  0x21   : > { %s618_s28 = scalar_lea.vmem %s617_s27, 4096  ;;  %p619_p1 = scmp.lt.s32.totalorder %s788_s6, %s617_s27 }
  0x22   : > { %p614_p9 = pnand %p612_p8, %p600_p0  ;;  %p620_p11 = scmp.lt.s32.totalorder %s618_s28, %s611_s22 }
  0x24   : > { %p615_p13 = pneg %p614_p9  ;;  %p621_p10 = por %p620_p11, %p619_p1 }
  0x26   : > { %p622_p6 = pnand %p621_p10, %p615_p13 }
  0x28   : > { %625 = shalt.err (!%p622_p6)
}
  0x29   : > { %s693_s29 = smov 256   ;;  %s694_s30 = smov 16  }
  0x2a   : > { %523 = dma.hbm_to_vmem [thread:$0]  (!%p784_p12), %s780_s4, 2048, %s788_s6, %s790_s8, %s693_s29, %s693_s29, %s694_s30  }
  0x2b   : > { %p498_p0 = scmp.ge.s32.totalorder %s690_s15, 1  ;;  %p156_p2 = scmp.lt.s32.totalorder %s690_s15, 5 }
  0x2d   : > { %p157_p3 = pnand %p498_p0, %p156_p2 }
  0x2e   : > { %s814_s5 = sand.u32 (!%p157_p3), 1, %s682_s13   ;;  %p1066_p6 = scmp.ne.s32.totalorder (!%p157_p3), %s1062_s23, 0 }
  0x2f   : > { %160 = sbr.rel (%p157_p3) target bundleno = 434 (0x1b2), region = 32  ;;  %s499_s9 = sshll.u32 (!%p157_p3), %s814_s5, 7 }
  0x30   : > { %s163_s10 = scalar_lea.sflag (!%p157_p3), [#allocation3], %s814_s5  ;;  %s820_s11 = scalar_lea.vmem (!%p157_p3), [#allocation2], %s499_s9 }
  0x34   : > { %669 = dma.done.wait (%p1066_p6), %s163_s10, 2048  }
  0x35   : > { %671 = vsyncadd (%p1066_p6), %s163_s10, 4294965248  ;;  %vm205_vm0 = vcmask 588800   ;;  %v827_v0 = vld [vmem:[%s820_s11] sm:$0xff]  ;;  %v830_v1 = vld [vmem:[%s820_s11 + $0x8] sm:$0xff]  ;;  %vm270_vm1 = vcmask 31744   ;;  %s968_s23 = scalar_lea.vmem [#allocation5], %s499_s9 }
  0x36   : > { %v833_v2 = vld [vmem:[%s820_s11 + $0x20] sm:$0xff]  ;;  %v206_v3 = vsel %vm205_vm0, %v830_v1, 0.0  ;;  %v838_v4 = vld [vmem:[%s820_s11 + $0x28] sm:$0xff]  ;;  %v841_v5 = vld [vmem:[%s820_s11 + $0x10] sm:$0xff]  ;;  %s515_s9 = sshll.u32 %s739_s16, 11  ;;  %s419_s4 = sshll.u32 %s968_s23, 4  ;;  %s1005_s4 = int_to_ptr.vmem [resolvable:$true] %s419_s4 }
  0x37   : > { %v844_v6 = vld [vmem:[%s820_s11 + $0x18] sm:$0xff]  ;;  %v207_v7 = vadd.f32 %v206_v3, %v827_v0  ;;  %v214_v8 = vsel %vm205_vm0, %v838_v4, 0.0  ;;  %v852_v10 = vld [vmem:[%s820_s11 + $0x30] sm:$0xff]  ;;  %v861_v14 = vld [vmem:[%s820_s11 + $0x48] sm:$0xff]  ;;  %s1003_s16 = scalar_lea.hbm %s1058_s3, %s515_s9  ;;  %s406_s8 = scalar_lea.sflag [#allocation4], %s814_s5 }
  0x38   : > { %v210_v9 = vsel %vm205_vm0, %v844_v6, 0.0  ;;  %v855_v11 = vld [vmem:[%s820_s11 + $0x38] sm:$0xff]  ;;  %v215_v12 = vadd.f32 %v214_v8, %v833_v2  ;;  %v869_v18 = vld [vmem:[%s820_s11 + $0x40] sm:$0xff]  ;;  %v222_v19 = vsel %vm205_vm0, %v861_v14, 0.0  ;;  %v874_v20 = vld [vmem:[%s820_s11 + $0x50] sm:$0xff]  ;;  %s626_s17 = scalar_lea.vmem %s1005_s4, 2048 }
  0x39   : > { %v218_v13 = vsel %vm205_vm0, %v855_v11, 0.0  ;;  %v864_v15 = vld [vmem:[%s820_s11 + $0x58] sm:$0xff]  ;;  %208 = vadd.xlane.f32.xlu0 %v207_v7  ;;  %v211_v16 = vadd.f32 %v210_v9, %v841_v5  ;;  %v879_v22 = vld [vmem:[%s820_s11 + $0x68] sm:$0xff]  ;;  %v223_v24 = vadd.f32 %v222_v19, %v869_v18  ;;  %v887_v26 = vld [vmem:[%s820_s11 + $0x60] sm:$0xff]  ;;  %p627_p10 = scmp.ne.s32.totalorder %s1005_s4, %s626_s17  ;;  %p1067_p11 = scmp.ne.s32.totalorder %s1063_s24, 0 }
  0x3a   : > { %216 = vadd.xlane.f32.xlu1 %v215_v12  ;;  %v219_v17 = vadd.f32 %v218_v13, %v852_v10  ;;  %v226_v21 = vsel %vm205_vm0, %v864_v15, 0.0  ;;  %v882_v23 = vld [vmem:[%s820_s11 + $0x78] sm:$0xff]  ;;  %v230_v27 = vsel %vm205_vm0, %v879_v22, 0.0  ;;  %v892_v28 = vld [vmem:[%s820_s11 + $0x70] sm:$0xff]  ;;  %v246_v35 = vld [vmem:[%s1056_s1] sm:$0xff]  ;;  %s695_s19 = smov [#allocation5]  }
  0x3b   : > { %v227_v25 = vadd.f32 %v226_v21, %v874_v20  ;;  %v234_v29 = vsel %vm205_vm0, %v882_v23, 0.0  ;;  %v231_v30 = vadd.f32 %v230_v27, %v887_v26  ;;  %v248_v37 = vld [vmem:[%s1056_s1 + $0x10] sm:$0xff]  ;;  %v247_v38 = vld [vmem:[%s1056_s1 + $0x8] sm:$0xff]  ;;  %v249_v42 = vld [vmem:[%s1056_s1 + $0x18] sm:$0xff]  ;;  %p628_p12 = pnand %p627_p10, %p1067_p11  ;;  %s630_s20 = sshll.u32 %s695_s19, 4  ;;  %s631_s20 = int_to_ptr.vmem [resolvable:$false] %s630_s20 }
  0x3c   : > { %v235_v31 = vadd.f32 %v234_v29, %v892_v28  ;;  %v250_v48 = vld [vmem:[%s1056_s1 + $0x20] sm:$0xff]  ;;  %v251_v53 = vld [vmem:[%s1056_s1 + $0x28] sm:$0xff]  ;;  %v252_v62 = vld [vmem:[%s1056_s1 + $0x30] sm:$0xff]  ;;  %s632_s22 = scalar_lea.vmem %s631_s20, 4096  ;;  %p633_p5 = scmp.lt.s32.totalorder %s1005_s4, %s631_s20 }
  0x3d   : > { %212 = vadd.xlane.f32.xlu0 %v211_v16  ;;  %v253_v8 = vld [vmem:[%s1056_s1 + $0x38] sm:$0xff]  ;;  %p629_p4 = pneg %p628_p12  ;;  %p634_p7 = scmp.lt.s32.totalorder %s632_s22, %s626_s17 }
  0x3e   : > { %220 = vadd.xlane.f32.xlu1 %v219_v17 }
  0x3f   : > { %p635_p8 = por %p634_p7, %p633_p5 }
  0x41   : > { %224 = vadd.xlane.f32.xlu0 %v223_v24  ;;  %p636_p9 = pnand %p635_p8, %p629_p4 }
  0x42   : > { %228 = vadd.xlane.f32.xlu1 %v227_v25 }
  0x45   : > { %232 = vadd.xlane.f32.xlu0 %v231_v30 }
  0x46   : > { %236 = vadd.xlane.f32.xlu1 %v235_v31 }
  0xc2   : > { %v209_v32 = vpop.xlane.xlu0 %208 }
  0xc3   : > { %v238_v33 = vmul.f32 0.005, %v209_v32  ;;  %v217_v34 = vpop.xlane.xlu1 %216 }
  0xc4   : > { %v240_v36 = vmul.f32 0.005, %v217_v34 }
  0xc5   : > { %v262_v40 = vmul.f32 %v246_v35, %v238_v33 }
  0xc6   : > { %v213_v39 = vpop.xlane.xlu0 %212  ;;  %v264_v45 = vmul.f32 %v248_v37, %v240_v36  ;;  %v255_v37 = vld [vmem:[%s1057_s2 + $0x8] sm:$0xff] }
  0xc7   : > { %v239_v41 = vmul.f32 0.005, %v213_v39  ;;  %v221_v43 = vpop.xlane.xlu1 %220  ;;  %v271_v50 = vsel %vm270_vm1, %v262_v40, 0.0  ;;  %v257_v40 = vld [vmem:[%s1057_s2 + $0x18] sm:$0xff] }
  0xc8   : > { %v241_v44 = vmul.f32 0.005, %v221_v43  ;;  %v274_v57 = vsel %vm270_vm1, %v264_v45, 0.0 }
  0xc9   : > { %v263_v46 = vmul.f32 %v247_v38, %v239_v41  ;;  %v254_v38 = vld [vmem:[%s1057_s2] sm:$0xff]  ;;  %v256_v41 = vld [vmem:[%s1057_s2 + $0x10] sm:$0xff] }
  0xca   : > { %v265_v47 = vmul.f32 %v249_v42, %v241_v44  ;;  %v225_v49 = vpop.xlane.xlu0 %224 }
  0xcb   : > { %v272_v51 = vsel %vm270_vm1, %v263_v46, 0.0  ;;  %v242_v52 = vmul.f32 0.005, %v225_v49  ;;  %v229_v54 = vpop.xlane.xlu1 %228  ;;  %v258_v49 = vld [vmem:[%s1057_s2 + $0x20] sm:$0xff] }
  0xcc   : > { %v273_v55 = vadd.f32 %v272_v51, %v271_v50  ;;  %v243_v56 = vmul.f32 0.005, %v229_v54  ;;  %v276_v58 = vsel %vm270_vm1, %v265_v47, 0.0  ;;  %v261_v54 = vld [vmem:[%s1057_s2 + $0x38] sm:$0xff] }
  0xcd   : > { %v266_v59 = vmul.f32 %v250_v48, %v242_v52  ;;  %v259_v48 = vld [vmem:[%s1057_s2 + $0x28] sm:$0xff] }
  0xce   : > { %v275_v60 = vadd.f32 %v274_v57, %v273_v55  ;;  %v267_v61 = vmul.f32 %v251_v53, %v243_v56  ;;  %v233_v63 = vpop.xlane.xlu0 %232  ;;  %v260_v55 = vld [vmem:[%s1057_s2 + $0x30] sm:$0xff] }
  0xcf   : > { %v278_v3 = vsel %vm270_vm1, %v266_v59, 0.0  ;;  %v244_v7 = vmul.f32 0.005, %v233_v63  ;;  %v237_v9 = vpop.xlane.xlu1 %236 }
  0xd0   : > { %v277_v12 = vadd.f32 %v276_v58, %v275_v60  ;;  %v245_v13 = vmul.f32 0.005, %v237_v9  ;;  %v280_v16 = vsel %vm270_vm1, %v267_v61, 0.0 }
  0xd1   : > { %v268_v17 = vmul.f32 %v252_v62, %v244_v7 }
  0xd2   : > { %v279_v19 = vadd.f32 %v278_v3, %v277_v12  ;;  %v269_v21 = vmul.f32 %v253_v8, %v245_v13 }
  0xd3   : > { %v282_v24 = vsel %vm270_vm1, %v268_v17, 0.0 }
  0xd4   : > { %v281_v25 = vadd.f32 %v280_v16, %v279_v19  ;;  %v284_v27 = vsel %vm270_vm1, %v269_v21, 0.0 }
  0xd6   : > { %v283_v29 = vadd.f32 %v282_v24, %v281_v25 }
  0xd8   : > { %v285_v30 = vadd.f32 %v284_v27, %v283_v29 }
  0xda   : > { %v286_v31 = vrot.slane %v285_v30, 4 }
  0xdc   : > { %v287_v32 = vadd.f32 %v286_v31, %v285_v30 }
  0xde   : > { %v288_v33 = vrot.slane %v287_v32, 2 }
  0xe0   : > { %v289_v34 = vadd.f32 %v288_v33, %v287_v32 }
  0xe2   : > { %v290_v35 = vrot.slane %v289_v34, 1 }
  0xe4   : > { %v291_v36 = vadd.f32 %v290_v35, %v289_v34 }
  0xe6   : > { %v292_v39 = vmax.f32 %v291_v36, 0.0 }
  0xe8   : > { %v294_v42 = vmul.f32 %v292_v39, %v255_v37  ;;  %v293_v43 = vmul.f32 %v292_v39, %v254_v38  ;;  %v296_v46 = vmul.f32 %v292_v39, %v257_v40  ;;  %v295_v47 = vmul.f32 %v292_v39, %v256_v41 }
  0xe9   : > { %v298_v52 = vmul.f32 %v292_v39, %v259_v48  ;;  %v297_v53 = vmul.f32 %v292_v39, %v258_v49  ;;  %v300_v58 = vmul.f32 %v292_v39, %v261_v54  ;;  %v299_v59 = vmul.f32 %v292_v39, %v260_v55 }
  0xea   : > { %v304_v44 = vsel %vm270_vm1, %v294_v42, 0.0  ;;  %v301_v45 = vsel %vm270_vm1, %v293_v43, 0.0  ;;  %v310_v50 = vsel %vm270_vm1, %v296_v46, 0.0  ;;  %v307_v51 = vsel %vm270_vm1, %v295_v47, 0.0 }
  0xeb   : > { %305 = vadd.xlane.f32.xlu1 %v304_v44  ;;  %302 = vadd.xlane.f32.xlu0 %v301_v45  ;;  %v316_v56 = vsel %vm270_vm1, %v298_v52, 0.0  ;;  %v313_v57 = vsel %vm270_vm1, %v297_v53, 0.0  ;;  %v322_v60 = vsel %vm270_vm1, %v300_v58, 0.0  ;;  %v319_v61 = vsel %vm270_vm1, %v299_v59, 0.0 }
  0xef   : > { %311 = vadd.xlane.f32.xlu1 %v310_v50  ;;  %308 = vadd.xlane.f32.xlu0 %v307_v51 }
  0xf3   : > { %317 = vadd.xlane.f32.xlu1 %v316_v56  ;;  %314 = vadd.xlane.f32.xlu0 %v313_v57 }
  0xf7   : > { %323 = vadd.xlane.f32.xlu1 %v322_v60  ;;  %320 = vadd.xlane.f32.xlu0 %v319_v61 }
 0x174   : > { %v306_v62 = vpop.xlane.xlu1 %305  ;;  %v303_v63 = vpop.xlane.xlu0 %302 }
 0x175   : > { %v502_v3 = vmul.f32 -1.442695, %v306_v62  ;;  %v501_v7 = vmul.f32 -1.442695, %v303_v63 }
 0x177   : > { %566 = vpow2.f32 %v502_v3 }
 0x178   : > { %568 = vpow2.f32 %v501_v7  ;;  %v312_v8 = vpop.xlane.xlu1 %311  ;;  %v309_v9 = vpop.xlane.xlu0 %308 }
 0x179   : > { %v504_v12 = vmul.f32 -1.442695, %v312_v8  ;;  %v503_v13 = vmul.f32 -1.442695, %v309_v9 }
 0x17b   : > { %570 = vpow2.f32 %v504_v12 }
 0x17c   : > { %572 = vpow2.f32 %v503_v13  ;;  %v318_v16 = vpop.xlane.xlu1 %317  ;;  %v315_v17 = vpop.xlane.xlu0 %314 }
 0x17d   : > { %v506_v19 = vmul.f32 -1.442695, %v318_v16  ;;  %v505_v21 = vmul.f32 -1.442695, %v315_v17 }
 0x17f   : > { %574 = vpow2.f32 %v506_v19 }
 0x180   : > { %576 = vpow2.f32 %v505_v21  ;;  %v324_v24 = vpop.xlane.xlu1 %323  ;;  %v321_v25 = vpop.xlane.xlu0 %320 }
 0x181   : > { %v508_v27 = vmul.f32 -1.442695, %v324_v24  ;;  %v507_v29 = vmul.f32 -1.442695, %v321_v25 }
 0x183   : > { %578 = vpow2.f32 %v508_v27 }
 0x184   : > { %v567_v30 = vpop.eup %566  ;;  %580 = vpow2.f32 %v507_v29 }
 0x185   : > { %v569_v31 = vpop.eup %568  ;;  %v350_v32 = vadd.f32 1.0, %v567_v30 }
 0x186   : > { %v349_v33 = vadd.f32 1.0, %v569_v31 }
 0x187   : > { %582 = vrcp.f32 %v350_v32 }
 0x188   : > { %v571_v34 = vpop.eup %570  ;;  %584 = vrcp.f32 %v349_v33 }
 0x189   : > { %v573_v35 = vpop.eup %572  ;;  %v352_v36 = vadd.f32 1.0, %v571_v34 }
 0x18a   : > { %v351_v37 = vadd.f32 1.0, %v573_v35 }
 0x18b   : > { %586 = vrcp.f32 %v352_v36 }
 0x18c   : > { %v575_v38 = vpop.eup %574  ;;  %588 = vrcp.f32 %v351_v37 }
 0x18d   : > { %v577_v39 = vpop.eup %576  ;;  %v354_v40 = vadd.f32 1.0, %v575_v38 }
 0x18e   : > { %v353_v41 = vadd.f32 1.0, %v577_v39 }
 0x18f   : > { %590 = vrcp.f32 %v354_v40 }
 0x190   : > { %v579_v42 = vpop.eup %578  ;;  %592 = vrcp.f32 %v353_v41 }
 0x191   : > { %v581_v43 = vpop.eup %580  ;;  %v356_v44 = vadd.f32 1.0, %v579_v42 }
 0x192   : > { %v355_v45 = vadd.f32 1.0, %v581_v43 }
 0x193   : > { %594 = vrcp.f32 %v356_v44 }
 0x194   : > { %v583_v46 = vpop.eup %582  ;;  %596 = vrcp.f32 %v355_v45 }
 0x195   : > { %v585_v47 = vpop.eup %584  ;;  %v375_v48 = vmul.f32 %v583_v46, %v841_v5  ;;  %v376_v49 = vmul.f32 %v583_v46, %v844_v6 }
 0x196   : > { %v373_v50 = vmul.f32 %v585_v47, %v827_v0  ;;  %v374_v51 = vmul.f32 %v585_v47, %v830_v1 }
 0x197   : > { %391 = vst [vmem:[%s968_s23 + $0x10] sm:$0xff] %v375_v48  ;;  %392 = vst.msk [vmem:[%s968_s23 + $0x18] sm:$0xff] %vm205_vm0, %v376_v49 }
 0x198   : > { %v587_v5 = vpop.eup %586  ;;  %389 = vst [vmem:[%s968_s23] sm:$0xff] %v373_v50  ;;  %390 = vst.msk [vmem:[%s968_s23 + $0x8] sm:$0xff] %vm205_vm0, %v374_v51 }
 0x199   : > { %v589_v0 = vpop.eup %588  ;;  %v379_v1 = vmul.f32 %v587_v5, %v852_v10  ;;  %v380_v6 = vmul.f32 %v587_v5, %v855_v11 }
 0x19a   : > { %v377_v52 = vmul.f32 %v589_v0, %v833_v2  ;;  %v378_v53 = vmul.f32 %v589_v0, %v838_v4 }
 0x19b   : > { %395 = vst [vmem:[%s968_s23 + $0x30] sm:$0xff] %v379_v1  ;;  %396 = vst.msk [vmem:[%s968_s23 + $0x38] sm:$0xff] %vm205_vm0, %v380_v6 }
 0x19c   : > { %v591_v54 = vpop.eup %590  ;;  %393 = vst [vmem:[%s968_s23 + $0x20] sm:$0xff] %v377_v52  ;;  %394 = vst.msk [vmem:[%s968_s23 + $0x28] sm:$0xff] %vm205_vm0, %v378_v53 }
 0x19d   : > { %v593_v55 = vpop.eup %592  ;;  %v383_v10 = vmul.f32 %v591_v54, %v874_v20  ;;  %v384_v56 = vmul.f32 %v591_v54, %v864_v15 }
 0x19e   : > { %v381_v11 = vmul.f32 %v593_v55, %v869_v18  ;;  %v382_v2 = vmul.f32 %v593_v55, %v861_v14 }
 0x19f   : > { %399 = vst [vmem:[%s968_s23 + $0x50] sm:$0xff] %v383_v10  ;;  %400 = vst.msk [vmem:[%s968_s23 + $0x58] sm:$0xff] %vm205_vm0, %v384_v56 }
 0x1a0   : > { %v595_v4 = vpop.eup %594  ;;  %397 = vst [vmem:[%s968_s23 + $0x40] sm:$0xff] %v381_v11  ;;  %398 = vst.msk [vmem:[%s968_s23 + $0x48] sm:$0xff] %vm205_vm0, %v382_v2 }
 0x1a1   : > { %v597_v15 = vpop.eup %596  ;;  %v387_v18 = vmul.f32 %v595_v4, %v892_v28  ;;  %v388_v20 = vmul.f32 %v595_v4, %v882_v23 }
 0x1a2   : > { %v385_v14 = vmul.f32 %v597_v15, %v887_v26  ;;  %v386_v57 = vmul.f32 %v597_v15, %v879_v22 }
 0x1a3   : > { %403 = vst [vmem:[%s968_s23 + $0x70] sm:$0xff] %v387_v18  ;;  %404 = vst.msk [vmem:[%s968_s23 + $0x78] sm:$0xff] %vm205_vm0, %v388_v20 }
 0x1a4   : > { %401 = vst [vmem:[%s968_s23 + $0x60] sm:$0xff] %v385_v14  ;;  %402 = vst.msk [vmem:[%s968_s23 + $0x68] sm:$0xff] %vm205_vm0, %v386_v57 }
 0x1a5   : > { %639 = shalt.err (!%p636_p9)
}
 0x1a6   : > { %s640_s26 = scalar_lea.hbm %s1003_s16, 2048  ;;  %s644_s29 = scalar_lea.hbm %s1058_s3, 8192 }
 0x1a7   : > { %p641_p13 = scmp.ne.s32.totalorder %s1003_s16, %s640_s26  ;;  %p645_p2 = scmp.lt.s32.totalorder %s1003_s16, %s1058_s3 }
 0x1a8   : > { %p646_p3 = scmp.lt.s32.totalorder %s644_s29, %s640_s26 }
 0x1a9   : > { %p642_p1 = pnand %p641_p13, %p1067_p11 }
 0x1aa   : > { %p647_p6 = por %p646_p3, %p645_p2 }
 0x1ab   : > { %p643_p0 = pneg %p642_p1 }
 0x1ad   : > { %p648_p10 = pnand %p647_p6, %p643_p0 }
 0x1af   : > { %651 = shalt.err (!%p648_p10)
}
 0x1b0   : > { %s696_s11 = smov 256   ;;  %s697_s23 = smov 16  }
 0x1b1   : > { %518 = dma.vmem_to_hbm [thread:$0]  (%p1067_p11), %s1005_s4, 2048, %s1003_s16, %s406_s8, %s696_s11, %s696_s11, %s697_s23  }
 0x1b2 PF: > { %p529_p12 = scmp.ge.s32.totalorder %s690_s15, 2  ;;  %s434_s9 = sand.u32 1, %s678_s12  }
 0x1b3   : > { %p1068_p4 = scmp.ne.s32.totalorder %s1064_s25, 0  ;;  %s435_s6 = scalar_lea.sflag [#allocation4], %s434_s9 }
 0x1b5   : > { %p525_p5 = pnand %p529_p12, %p1068_p4 }
 0x1b7   : > { %p526_p7 = pneg %p525_p5 }
 0x1b9   : > { %673 = dma.done.wait (%p526_p7), %s435_s6, 2048  }
 0x1ba   : > { %675 = vsyncadd (%p526_p7), %s435_s6, 4294965248  ;;  %p16_p8 = scmp.ge.s32.totalorder %s743_s18, 6   ;;  %s1069_s12 = smov %s682_s13 }
 0x1bb   : > { %s1070_s13 = smov %s686_s14  ;;  %s1071_s14 = smov %s755_s21 }
 0x1bc   : > { %s1072_s15 = smov %s743_s18  ;;  %18 = sbr.rel (!%p16_p8) target bundleno = 5 (0x5), region = 77 }
 0x1c1   :  { %440 = vsyncpa [#allocation3], 1 }
 0x1c2   :  { %442 = vsyncpa [#allocation3 + $0x1], 1 }
 0x1c3   :  { %443 = vsyncpa [#allocation4], 1 }
 0x1c4   :  { %445 = vsyncpa [#allocation4 + $0x1], 1 }

</bundles_post_ra>
